<compile_context>
chip_gen: v5e
topology: v5e:2x2
jax: 0.10.0
libtpu: 0.0.40
codegen_flags: <defaults>
</compile_context>

<pallas_src>
import functools

import jax
import jax.numpy as jnp
from jax.experimental import pallas as pl
from jax.experimental.pallas import tpu as pltpu

# Finite mask value: avoids exp(-inf - -inf) = NaN if a row is ever fully masked.
_MASK_VALUE = -1e30


def _qkv_proj_kernel(x_ref, wqkv_ref, qkv_ref):
    # x_ref:    (1, TQ, C)   bf16
    # wqkv_ref: (C, 3*D)     bf16   columns = [Q heads | K heads | V heads]
    # qkv_ref:  (1, TQ, 3*D) bf16
    qkv = jnp.dot(x_ref[0], wqkv_ref[...], preferred_element_type=jnp.float32)
    qkv_ref[0] = qkv.astype(qkv_ref.dtype)           # single full-width cast


def _flash_attn_proj_kernel(q_ref, k_ref, v_ref, wo_ref, bo_ref, o_ref,
                            m_ref, l_ref, acc_ref, *, scale, q_blk, kv_blk):
    # q_ref:  (1, NH, TQ,  H) bf16      wo_ref: (NH, H, C) bf16
    # k_ref:  (1, NH, TKV, H) bf16      bo_ref: (1, C)     f32
    # v_ref:  (1, NH, TKV, H) bf16      o_ref:  (1, TQ, C) f32
    # scratch: m/l (NH, TQ, 1) f32, acc (NH, TQ, H) f32
    qi = pl.program_id(1)
    ki = pl.program_id(2)

    @pl.when(ki == 0)
    def _init():
        m_ref[...] = jnp.full(m_ref.shape, _MASK_VALUE, jnp.float32)
        l_ref[...] = jnp.zeros(l_ref.shape, jnp.float32)
        acc_ref[...] = jnp.zeros(acc_ref.shape, jnp.float32)

    q_start = qi * q_blk
    kv_start = ki * kv_blk

    # Skip KV blocks that lie entirely in the causal future of this Q block.
    @pl.when(kv_start <= q_start + (q_blk - 1))
    def _compute():
        q = q_ref[0]                                  # (NH, TQ, H)
        k = k_ref[0]                                  # (NH, TKV, H)
        v = v_ref[0]                                  # (NH, TKV, H)

        # All heads batched in one MXU pass; contraction on the last axis of
        # both operands (no explicit transpose of K).
        s = jnp.einsum('hqd,hkd->hqk', q, k,
                       preferred_element_type=jnp.float32) * scale   # (NH,TQ,TKV)

        rows = q_start + jax.lax.broadcasted_iota(jnp.int32, (q_blk, kv_blk), 0)
        cols = kv_start + jax.lax.broadcasted_iota(jnp.int32, (q_blk, kv_blk), 1)
        causal = cols <= rows                         # (TQ, TKV), broadcast over heads
        s = jnp.where(causal, s, _MASK_VALUE)         # finite mask, no -inf

        m_prev = m_ref[...]
        m_next = jnp.maximum(m_prev, jnp.max(s, axis=-1, keepdims=True))
        alpha = jnp.exp(m_prev - m_next)
        p = jnp.exp(s - m_next)
        p = jnp.where(causal, p, 0.0)                 # robust even for fully-masked rows
        # TODO(synk): attention-weight dropout is identity in eval mode; omitted.

        l_ref[...] = alpha * l_ref[...] + jnp.sum(p, axis=-1, keepdims=True)
        acc_ref[...] = alpha * acc_ref[...] + jnp.einsum(
            'hqk,hkd->hqd', p.astype(jnp.bfloat16), v,
            preferred_element_type=jnp.float32)
        m_ref[...] = m_next

    @pl.when(ki == pl.num_programs(2) - 1)
    def _finalize():
        # Softmax normalization on the EUP (off the VALU critical path).
        ctx = acc_ref[...] * pl.reciprocal(l_ref[...], approx=True)   # (NH,TQ,H)
        # Per-head accumulation into the output projection instead of a lane-wise
        # concat: every matmul is lane-dense in N = C, heads reduced on the VPU.
        proj = jnp.einsum('hqd,hdc->hqc', ctx.astype(jnp.bfloat16), wo_ref[...],
                          preferred_element_type=jnp.float32)          # (NH,TQ,C)
        out = jnp.sum(proj, axis=0) + bo_ref[...]                      # (TQ, C)
        # TODO(synk): post-projection dropout is identity in eval mode; omitted.
        o_ref[0] = out.astype(o_ref.dtype)


def mha_forward(x, w_qkv, w_out, b_out, *, num_heads, head_size,
                q_block=None, kv_block=None):
    """Multi-head causal self-attention + output projection (forward only).

    Args:
      x:      (B, T, C) float32
      w_qkv:  (C, 3*num_heads*head_size), columns = [Q heads | K heads | V heads]
      w_out:  (num_heads*head_size, C)
      b_out:  (1, C) float32
    Returns:
      (B, T, C) float32
    """
    B, T, C = x.shape
    NH, H = num_heads, head_size
    D = NH * H
    assert w_qkv.shape == (C, 3 * D) and w_out.shape == (D, C)

    # Default blocks: full sequence at demo sizes, 128 at scale.  On v6e/v5e
    # (128 MiB VMEM) these can be raised (e.g. 256-512); keep smaller on v7x
    # (64 MiB physical) — re-derive the VMEM budget per generation.
    q_block = min(T, 128) if q_block is None else q_block
    kv_block = min(T, 128) if kv_block is None else kv_block
    assert T % q_block == 0 and T % kv_block == 0

    # bf16 at the pallas_call boundary (halves DMA bytes of streamed operands);
    # all MXU matmuls accumulate in f32.  Weights cast once here, not per step.
    x_bf = x.astype(jnp.bfloat16)
    wqkv_bf = w_qkv.astype(jnp.bfloat16)
    wo3_bf = w_out.reshape(NH, H, C).astype(jnp.bfloat16)
    b_out = b_out.reshape(1, C).astype(jnp.float32)

    # ---- Stage 1: fused QKV projection (one lane-dense matmul for all heads). ----
    qkv = pl.pallas_call(
        _qkv_proj_kernel,
        out_shape=jax.ShapeDtypeStruct((B, T, 3 * D), jnp.bfloat16),
        grid_spec=pltpu.PrefetchScalarGridSpec(
            num_scalar_prefetch=0,
            grid=(B, T // q_block),
            in_specs=[
                pl.BlockSpec((1, q_block, C), lambda b, i: (b, i, 0)),
                pl.BlockSpec((C, 3 * D), lambda b, i: (0, 0)),
            ],
            out_specs=pl.BlockSpec((1, q_block, 3 * D), lambda b, i: (b, i, 0)),
        ),
        compiler_params=pltpu.CompilerParams(
            dimension_semantics=("parallel", "parallel")),
    )(x_bf, wqkv_bf)

    # Layout plumbing (not compute): split components/heads so the attention
    # kernel sees (B, NH, T, H) and can batch every head in one dot_general.
    qkv = qkv.reshape(B, T, 3, NH, H)
    q = jnp.transpose(qkv[:, :, 0], (0, 2, 1, 3))    # (B, NH, T, H) bf16
    k = jnp.transpose(qkv[:, :, 1], (0, 2, 1, 3))
    v = jnp.transpose(qkv[:, :, 2], (0, 2, 1, 3))

    # NOTE: the PyTorch module scales by emb_dim ** -0.5 (n_embd, NOT head_size);
    # kept intentionally to match the reference module.
    scale = float(C) ** -0.5

    kernel = functools.partial(_flash_attn_proj_kernel, scale=scale,
                               q_blk=q_block, kv_blk=kv_block)

    # ---- Stage 2: flash attention (online softmax) + fused output projection. ----
    return pl.pallas_call(
        kernel,
        out_shape=jax.ShapeDtypeStruct((B, T, C), jnp.float32),
        grid_spec=pltpu.PrefetchScalarGridSpec(
            num_scalar_prefetch=0,
            grid=(B, T // q_block, T // kv_block),
            in_specs=[
                pl.BlockSpec((1, NH, q_block, H), lambda b, qi, ki: (b, 0, qi, 0)),
                pl.BlockSpec((1, NH, kv_block, H), lambda b, qi, ki: (b, 0, ki, 0)),
                pl.BlockSpec((1, NH, kv_block, H), lambda b, qi, ki: (b, 0, ki, 0)),
                pl.BlockSpec((NH, H, C), lambda b, qi, ki: (0, 0, 0)),
                pl.BlockSpec((1, C), lambda b, qi, ki: (0, 0)),
            ],
            out_specs=pl.BlockSpec((1, q_block, C), lambda b, qi, ki: (b, qi, 0)),
            scratch_shapes=[
                pltpu.VMEM((NH, q_block, 1), jnp.float32),   # m: running max
                pltpu.VMEM((NH, q_block, 1), jnp.float32),   # l: running denom
                pltpu.VMEM((NH, q_block, H), jnp.float32),   # acc: running context
            ],
        ),
        compiler_params=pltpu.CompilerParams(
            dimension_semantics=("parallel", "parallel", "arbitrary"),
            vmem_limit_bytes=64 * 1024 * 1024),
    )(q, k, v, wo3_bf, b_out)


def _reference(x, wq_heads, wk_heads, wv_heads, w_out, b_out):
    """Pure-JAX f32 reference mirroring the PyTorch MultiHeadAttention forward."""
    B, T, C = x.shape
    tril = jnp.tril(jnp.ones((T, T), dtype=bool))
    outs = []
    for wq, wk, wv in zip(wq_heads, wk_heads, wv_heads):
        k = x @ wk
        q = x @ wq
        v = x @ wv
        wei = (q @ jnp.swapaxes(k, -2, -1)) * (C ** -0.5)
        wei = jnp.where(tril, wei, -jnp.inf)
        wei = jax.nn.softmax(wei, axis=-1)
        outs.append(wei @ v)
    cat = jnp.concatenate(outs, axis=-1)
    return cat @ w_out + b_out


if __name__ == "__main__":
    # Small shapes consistent with the module (num_heads * head_size == n_embd).
    batch_size = 2
    seq_len = 8          # == block_size (full sequence)
    n_embd = 32
    num_heads = 2
    head_size = 16
    D = num_heads * head_size

    key = jax.random.PRNGKey(0)
    kx, kw, ko, kb = jax.random.split(key, 4)

    x = jax.random.normal(kx, (batch_size, seq_len, n_embd), dtype=jnp.float32)

    # Per-head Linear(n_embd, head_size, bias=False) weights, stored as (C, H)
    # so the kernel computes x @ W. PyTorch-like U(-1/sqrt(fan_in), 1/sqrt(fan_in)).
    bound = 1.0 / (n_embd ** 0.5)
    head_keys = jax.random.split(kw, 3 * num_heads)
    wq_heads = [jax.random.uniform(head_keys[3 * h + 0], (n_embd, head_size),
                                   jnp.float32, -bound, bound) for h in range(num_heads)]
    wk_heads = [jax.random.uniform(head_keys[3 * h + 1], (n_embd, head_size),
                                   jnp.float32, -bound, bound) for h in range(num_heads)]
    wv_heads = [jax.random.uniform(head_keys[3 * h + 2], (n_embd, head_size),
                                   jnp.float32, -bound, bound) for h in range(num_heads)]

    # Output projection Linear(n_embd, n_embd) with bias, stored as (D, C).
    bound_o = 1.0 / (D ** 0.5)
    w_out = jax.random.uniform(ko, (D, n_embd), jnp.float32, -bound_o, bound_o)
    b_out = jax.random.uniform(kb, (1, n_embd), jnp.float32, -bound_o, bound_o)

    # Fused QKV weight: columns = [Q for all heads | K for all heads | V for all heads].
    w_qkv = jnp.concatenate(wq_heads + wk_heads + wv_heads, axis=1)  # (C, 3D)

    out = mha_forward(x, w_qkv, w_out, b_out,
                      num_heads=num_heads, head_size=head_size)
    jax.block_until_ready(out)

    ref = _reference(x, wq_heads, wk_heads, wv_heads, w_out, b_out)
    assert out.shape == (batch_size, seq_len, n_embd)
    # bf16 MXU operands (f32 accumulation) + approx reciprocal vs an all-f32
    # reference -> loosened tolerance.
    assert jnp.allclose(out, ref, atol=2e-2, rtol=2e-2), "mismatch vs reference"

    print("KERNEL_OK")
</pallas_src>

<mosaic_0001>
module attributes {stable_mosaic.version = 11 : i64} {
  func.func @_qkv_proj_kernel(%arg0: i32, %arg1: i32, %arg2: memref<1x8x32xbf16, #tpu.memory_space<vmem>>, %arg3: memref<32x96xbf16, #tpu.memory_space<vmem>>, %arg4: memref<1x8x96xbf16, #tpu.memory_space<vmem>>) attributes {dimension_semantics = [#tpu.dimension_semantics<parallel>, #tpu.dimension_semantics<parallel>], iteration_bounds = array<i64: 2, 1>, scalar_prefetch = 0 : i64, scratch_operands = 0 : i64, tpu.core_type = #tpu.core_type<tc>, window_params = [{transform_indices = @transform_0, window_bounds = array<i64: 1, 8, 32>}, {pipeline_mode = #tpu.pipeline_mode<synchronous>, transform_indices = @transform_1, window_bounds = array<i64: 32, 96>}, {transform_indices = @transform_2, window_bounds = array<i64: 1, 8, 96>}]} {
    %c0 = arith.constant 0 : index
    %c0_0 = arith.constant 0 : index
    %c0_1 = arith.constant 0 : index
    %0 = vector.load %arg2[%c0, %c0_0, %c0_1] : memref<1x8x32xbf16, #tpu.memory_space<vmem>>, vector<1x8x32xbf16>
    %1 = vector.shape_cast %0 : vector<1x8x32xbf16> to vector<8x32xbf16>
    %c0_2 = arith.constant 0 : index
    %c0_3 = arith.constant 0 : index
    %2 = vector.load %arg3[%c0_2, %c0_3] : memref<32x96xbf16, #tpu.memory_space<vmem>>, vector<32x96xbf16>
    %cst = arith.constant dense<0.000000e+00> : vector<8x96xf32>
    %3 = tpu.matmul %1, %2, %cst {dimension_numbers = #tpu.dot_dimension_numbers<[1], [0], [0], [1], [0, 0, 1, 1], [], []>} : vector<8x32xbf16>, vector<32x96xbf16>, vector<8x96xf32> -> vector<8x96xf32>
    %4 = arith.truncf %3 : vector<8x96xf32> to vector<8x96xbf16>
    %c0_4 = arith.constant 0 : index
    %c0_5 = arith.constant 0 : index
    %c0_6 = arith.constant 0 : index
    %5 = vector.load %arg4[%c0_4, %c0_5, %c0_6] : memref<1x8x96xbf16, #tpu.memory_space<vmem>>, vector<1x8x96xbf16>
    %6 = vector.shape_cast %5 : vector<1x8x96xbf16> to vector<8x96xbf16>
    %7 = vector.shape_cast %4 : vector<8x96xbf16> to vector<1x8x96xbf16>
    tpu.vector_store %arg4[%c0_4, %c0_5, %c0_6], %7 {strides = array<i32>} : memref<1x8x96xbf16, #tpu.memory_space<vmem>>, vector<1x8x96xbf16>,
    return
  }
  func.func @transform_0(%arg0: i32, %arg1: i32) -> (i32, i32, i32) {
    %c0_i32 = arith.constant 0 : i32
    %c0_i32_0 = arith.constant 0 : i32
    return %arg0, %arg1, %c0_i32 : i32, i32, i32
  }
  func.func @transform_1(%arg0: i32, %arg1: i32) -> (i32, i32) {
    %c0_i32 = arith.constant 0 : i32
    %c0_i32_0 = arith.constant 0 : i32
    %c0_i32_1 = arith.constant 0 : i32
    return %c0_i32, %c0_i32_0 : i32, i32
  }
  func.func @transform_2(%arg0: i32, %arg1: i32) -> (i32, i32, i32) {
    %c0_i32 = arith.constant 0 : i32
    %c0_i32_0 = arith.constant 0 : i32
    return %arg0, %arg1, %c0_i32 : i32, i32, i32
  }
}

</mosaic_0001>

<bundles_post_ra>
// kernel: tpu_custom_call.1
= control target key start
LH: loop header
LB: loop body
LE: loop exit
PB: predicated region body
PF: predicated region fallthrough
CT: control target
= control target key end

     0   :  { %7 = vsyncpa [#allocation3], 0  ;;  %s750_s0 = inlined_call_operand.hbm [shape: bf16[2,8,32], index: 0, kind: input, shape index: {}]   ;;  %s751_s1 = inlined_call_operand.hbm [shape: bf16[32,96], index: 1, kind: input, shape index: {}]   ;;  %s752_s2 = inlined_call_operand.hbm [shape: bf16[2,8,96], index: 2, kind: output, shape index: {}]  }
   0x1   :  { %9 = vsyncpa [#allocation3 + $0x1], 0 }
   0x2   :  { %10 = vsyncpa [#allocation6], 0 }
   0x3   :  { %11 = vsyncpa [#allocation4], 0 }
   0x4   :  { %13 = vsyncpa [#allocation4 + $0x1], 0  ;;  %s607_s9 = smov 0   ;;  %s609_s10 = smov 0  }
   0x5   :  { %s611_s11 = smov 0   ;;  %s613_s12 = smov 0  }
   0x6   :  { %s615_s13 = smov 0   ;;  %s617_s14 = smov 0  }
   0x7 LB: > { %s340_s15 = sadd.s32 4294967295, %s587_s14   ;;  %p342_p0 = scmp.ge.s32.totalorder %s587_s14, 1  ;;  %s587_s14 = sphi %s617_s14, %s19_s14   ;;  %s583_s13 = sphi %s615_s13, %s763_s13   ;;  %s579_s12 = sphi %s613_s12, %s762_s12   ;;  %s575_s11 = sphi %s611_s11, %s761_s11   ;;  %s571_s10 = sphi %s609_s10, %s760_s10   ;;  %s567_s9 = sphi %s607_s9, %s759_s9  }
   0x8   : > { %p639_p1 = scmp.eq.s32.totalorder %s340_s15, 0  ;;  %p113_p2 = scmp.lt.s32.totalorder %s587_s14, 3 }
   0x9   : > { %s124_s19 = sshll.u32 %s751_s1, 4  ;;  %s589_s21 = smov [#allocation5]   ;;  %s125_s19 = int_to_ptr.hbm [resolvable:$true] %s124_s19 }
   0xa   : > { %p647_p3 = pnand %p342_p0, %p113_p2  ;;  %s126_s22 = sshll.u32 %s589_s21, 4  ;;  %s127_s22 = int_to_ptr.vmem [resolvable:$true] %s126_s22 }
   0xb   : > { %p344_p6 = scmp.ge.s32.totalorder %s587_s14, 2  ;;  %s590_s23 = smov 64  }
   0xc   : > { %p374_p4 = pneg %p647_p3  ;;  %s591_s24 = smov 4  }
   0xd   : > { %s341_s25 = sadd.s32 4294967294, %s587_s14   ;;  %s31_s26 = sadd.s32 1, %s583_s13 }
   0xe   : > { %p375_p5 = pnand %p374_p4, %p639_p1  ;;  %s40_s27 = sadd.s32 1, %s575_s11 }
   0xf   : > { %p33_p7 = scmp.ge.s32.totalorder %s31_s26, 2  ;;  %p47_p8 = scmp.ne.s32.totalorder %s575_s11, %s571_s10 }
  0x10   : > { %377 = dma.hbm_to_vmem [thread:$0]  (!%p375_p5), %s125_s19, 256, %s127_s22, [#allocation6], %s590_s23, %s590_s23, %s591_s24  }
  0x11   : > { %p48_p9 = scmp.eq.s32.totalorder %s587_s14, 0  ;;  %p53_p10 = scmp.ne.s32.totalorder %s571_s10, %s567_s9 }
  0x12   : > { %s765_s26 = smov (%p33_p7, %s31_s26), 0  ;;  %p100_p13 = scmp.eq.s32.totalorder %s340_s15, 1 }
  0x13   : > { %p666_p11 = por %p48_p9, %p47_p8  ;;  %p672_p12 = por %p639_p1, %p53_p10 }
  0x14   : > { %s35_s30 = ssub.s32 %s583_s13, %s765_s26  ;;  %p106_p2 = scmp.eq.s32.totalorder %s341_s25, 1 }
  0x15   : > { %p38_p0 = scmp.eq.s32.totalorder %s35_s30, 0  ;;  %p678_p4 = por %p100_p13, %p47_p8 }
  0x16   : > { %p387_p5 = scmp.lt.s32.totalorder %s587_s14, 2  ;;  %p686_p7 = por %p106_p2, %p53_p10 }
  0x17   : > { %s684_s4 = scalar_select %p38_p0, %s575_s11, %s40_s27  }
  0x18   : > { %s140_s6 = sand.u32 1, %s575_s11   ;;  %s346_s8 = sshll.u32 %s583_s13, 2 }
  0x19   : > { %s345_s7 = sshll.u32 %s140_s6, 2  ;;  %s149_s15 = scalar_lea.hbm %s750_s0, %s346_s8 }
  0x1a   : > { %s144_s19 = scalar_lea.vmem [#allocation2], %s345_s7  ;;  %s151_s22 = sshll.u32 %s149_s15, 4  ;;  %s152_s22 = int_to_ptr.hbm [resolvable:$true] %s151_s22 }
  0x1b   : > { %s153_s21 = sshll.u32 %s144_s19, 4  ;;  %p379_p8 = pnand %p387_p5, %p666_p11  ;;  %s154_s21 = int_to_ptr.vmem [resolvable:$true] %s153_s21 }
  0x1c   : > { %s141_s23 = scalar_lea.sflag [#allocation3], %s140_s6  ;;  %162 = sbr.rel (%p647_p3) target bundleno = 178 (0xb2), region = 28 }
  0x1d   : > { %381 = dma.hbm_to_vmem [thread:$0]  (!%p379_p8), %s152_s22, 64, %s154_s21, %s141_s23  }
  0x1e   : > { %s700_s24 = sand.u32 (!%p647_p3), 1, %s571_s10  }
  0x1f   : > { %s348_s25 = sshll.u32 (!%p647_p3), %s700_s24, 2  ;;  %s165_s27 = scalar_lea.sflag (!%p647_p3), [#allocation3], %s700_s24 }
  0x20   : > { %s168_s30 = scalar_lea.vmem (!%p647_p3), [#allocation2], %s348_s25 }
  0x21   : > { %554 = dma.done.wait (%p672_p12), %s165_s27, 64  }
  0x22   : > { %556 = vsyncadd (%p672_p12), %s165_s27, 4294967232 }
  0x23   : > { %558 = dma.done.wait (%p639_p1), [#allocation6], 256  }
  0x24   : > { %560 = vsyncadd (%p639_p1), [#allocation6], 4294967040  ;;  %v365_v0 = vld [vmem:[#allocation5 + $0x8] sm:$0xff]  ;;  %v364_v1 = vld [vmem:[#allocation5] sm:$0xff]  ;;  %vm213_vm0 = vcmask 261120   ;;  %s361_s20 = sshll.u32 %s579_s12, 2 }
  0x25   : > { %223 = vmatpush.bf16.msra.mxu0 %v365_v0  ;;  %v196_v2 = vld [vmem:[%s168_s30] sm:$0xf]  ;;  %s245_s29 = scalar_lea.hbm %s752_s2, %s361_s20  ;;  %s194_s7 = scalar_lea.vmem [#allocation7], %s348_s25  ;;  %vm231_vm1 = vcmask 781312  }
  0x26   : > { %s247_s8 = sshll.u32 %s194_s7, 4  ;;  %s249_s17 = sshll.u32 %s245_s29, 4  ;;  %s248_s8 = int_to_ptr.vmem [resolvable:$true] %s247_s8  ;;  %s250_s17 = int_to_ptr.hbm [resolvable:$true] %s249_s17 }
  0x27   : > { %s234_s16 = scalar_lea.sflag [#allocation4], %s700_s24  ;;  %s515_s18 = sshra.s32 %s250_s17, 4  ;;  %s516_s18 = int_to_ptr.hbm [resolvable:$true] %s515_s18 }
  0x28   : > { %s517_s15 = scalar_lea.hbm %s516_s18, 4  ;;  %s521_s21 = scalar_lea.hbm %s752_s2, 8 }
  0x29   : > { %224 = vmatpush.bf16.msra.mxu0 %v364_v1  ;;  %p518_p1 = scmp.ne.s32.totalorder %s516_s18, %s517_s15  ;;  %p522_p10 = scmp.lt.s32.totalorder %s516_s18, %s752_s2 }
  0x2a   : > { %p523_p11 = scmp.lt.s32.totalorder %s521_s21, %s517_s15 }
  0x2b   : > { %p519_p3 = pnand %p518_p1, %p678_p4 }
  0x2c   : > { %359 = vmatmul.msk.bf16.vlgmr.msra.gmra.mxu0 %vm213_vm0, %v196_v2  ;;  %p524_p12 = por %p523_p11, %p522_p10 }
  0x2d   : > { %p520_p9 = pneg %p519_p3 }
  0x2f   : > { %p525_p13 = pnand %p524_p12, %p520_p9 }
  0xa9   : > { %v226_v3 = vpop.f32.mrf.mxu0 }
  0xaa   : > { %v230_v4 = vpack.c.bf16 %v226_v3, %v226_v3 }
  0xac   : > { %232 = vst.msk [vmem:[%s194_s7] sm:$0xf] %vm231_vm1, %v230_v4 }
  0xad   : > { %528 = shalt.err (!%p525_p13)
}
  0xae   : > { %372 = dma.vmem_to_hbm [thread:$0]  (%p678_p4), %s248_s8, 64, %s250_s17, %s234_s16  }
  0xb1   : > { %v228_v5 = vpop.f32.mrf.mxu0 }
  0xb2 PF: > { %s261_s24 = sand.u32 1, %s567_s9   ;;  %p383_p0 = pnand %p344_p6, %p686_p7 }
  0xb3   : > { %s262_s25 = scalar_lea.sflag [#allocation4], %s261_s24 }
  0xb4   : > { %p384_p2 = pneg %p383_p0 }
  0xb6   : > { %562 = dma.done.wait (%p384_p2), %s262_s25, 64  }
  0xb7   : > { %564 = vsyncadd (%p384_p2), %s262_s25, 4294967232  ;;  %s19_s14 = sadd.s32 1, %s587_s14   ;;  %s759_s9 = smov %s571_s10 }
  0xb8   : > { %p16_p5 = scmp.ge.s32.totalorder %s19_s14, 4   ;;  %s760_s10 = smov %s575_s11 }
  0xb9   : > { %s761_s11 = smov %s684_s4  ;;  %s762_s12 = smov %s583_s13 }
  0xba   : > { %s763_s13 = smov %s765_s26  ;;  %18 = sbr.rel (!%p16_p5) target bundleno = 7 (0x7), region = 77 }
  0xbf   :  { %268 = vsyncpa [#allocation3], 1 }
  0xc0   :  { %270 = vsyncpa [#allocation3 + $0x1], 1 }
  0xc1   :  { %271 = vsyncpa [#allocation6], 1 }
  0xc2   :  { %272 = vsyncpa [#allocation4], 1 }
  0xc3   :  { %274 = vsyncpa [#allocation4 + $0x1], 1 }

</bundles_post_ra>
